<compile_context>
chip_gen: v7x
topology: tpu7x:2x2x1
jax: 0.10.0
libtpu: 0.0.40
codegen_flags: <defaults>
</compile_context>

<pallas_src>
import jax
import jax.numpy as jnp
import numpy as np
from jax.experimental import pallas as pl
from jax.experimental.pallas import tpu as pltpu


def _rope_kernel(x_ref, cos_ref, sina_ref, sinb_ref, o_ref):
    """Interleaved RoPE on one (1, tS, W) tile, W = num_heads * head_dim.

    out[..., 2k]   = x[..., 2k] * c_k - x[..., 2k+1] * s_k
    out[..., 2k+1] = x[..., 2k] * s_k + x[..., 2k+1] * c_k

    With sign/parity pre-baked into the tables this is:
      out = x * cos + roll(x, +1 lane) * sin_a + roll(x, -1 lane) * sin_b
    The roll wraparound lanes (0 and W-1) are multiplied by table zeros, so
    they never contribute.
    """
    x = x_ref[...].astype(jnp.float32)            # (1, tS, W)
    W = x.shape[-1]
    x_up = pltpu.roll(x, shift=W - 1, axis=2)     # x_up[..., j] = x[..., (j+1) % W]
    x_dn = pltpu.roll(x, shift=1, axis=2)         # x_dn[..., j] = x[..., (j-1) % W]
    out = x * cos_ref[...] + x_up * sina_ref[...] + x_dn * sinb_ref[...]
    o_ref[...] = out.astype(o_ref.dtype)


def _build_tables(dim: int, end: int, theta: float):
    """cos / signed-sin tables of shape (end, dim), f32, interleaved layout."""
    assert dim % 2 == 0
    half = dim // 2
    inv_freq = 1.0 / (theta ** (jnp.arange(0, dim, 2, dtype=jnp.float32)[:half] / dim))
    t = jnp.arange(end, dtype=jnp.float32)
    freqs = jnp.outer(t, inv_freq)                # (end, dim//2)
    cos = jnp.cos(freqs)
    sin = jnp.sin(freqs)
    zeros = jnp.zeros_like(sin)
    cos_full = jnp.repeat(cos, 2, axis=-1)                          # [c0,c0,c1,c1,...]
    sin_a = jnp.stack([-sin, zeros], axis=-1).reshape(end, dim)     # [-s0,0,-s1,0,...]
    sin_b = jnp.stack([zeros, sin], axis=-1).reshape(end, dim)      # [0,s0,0,s1,...]
    return cos_full, sin_a, sin_b


def rotary_embedding(x, *, dim, end, theta=10000.0, position_ids=None, seq_tile=1024):
    """Pallas RoPE. x: (B, S, H, D) with D == dim. Returns same shape/dtype."""
    B, S, H, D = x.shape
    assert D == dim and D % 2 == 0
    orig_dtype = x.dtype
    W = H * D

    # ---- buffer-regrowth (host-side config, mirrors the nn.Module) --------
    cur_end = end
    while S >= cur_end:
        cur_end *= 2
    if position_ids is not None:
        # TODO(synk): with traced position_ids the table size must be chosen
        # statically (e.g. pass a max_position); here we require concrete ids.
        max_pos = int(np.max(np.asarray(jax.device_get(position_ids))))
        while max_pos >= cur_end:
            cur_end *= 2

    cos_d, sina_d, sinb_d = _build_tables(dim, cur_end, theta)     # (cur_end, D) f32
    # Repeat per head so the tables line up with the flattened H*D lane axis.
    cos_w = jnp.tile(cos_d, (1, H))                                # (cur_end, W)
    sina_w = jnp.tile(sina_d, (1, H))
    sinb_w = jnp.tile(sinb_d, (1, H))

    if position_ids is None:
        # Single (1, S, W) tables; block index is constant across the inner
        # batch axis, so Pallas skips the re-fetch between consecutive steps.
        cos, sina, sinb = cos_w[:S][None], sina_w[:S][None], sinb_w[:S][None]
        cs_index_map = lambda s, b: (0, s, 0)
    else:
        # TODO(synk): wrapper-side gather materializes (B, S, W) tables; a
        # scalar-prefetch index_map could avoid this for contiguous positions.
        pos = position_ids.astype(jnp.int32)
        cos, sina, sinb = cos_w[pos], sina_w[pos], sinb_w[pos]     # (B, S, W)
        cs_index_map = lambda s, b: (b, s, 0)

    # ---- sequence tiling, sized against a ~24 MiB VMEM budget (v7x-safe) --
    x_bytes = x.dtype.itemsize
    if S <= seq_tile:
        tS = S
    else:
        # double-buffered x in/out + 3 double-buffered f32 tables + f32 temps
        per_row = W * (4 * x_bytes + 44)
        cap = max(8, ((24 * 1024 * 1024) // per_row) // 8 * 8)
        tS = max(8, (min(seq_tile, cap) // 8) * 8)
    n_s = pl.cdiv(S, tS)

    x_flat = x.reshape(B, S, W)                    # free: contiguous layout
    x_spec = pl.BlockSpec((1, tS, W), lambda s, b: (b, s, 0))
    cs_spec = pl.BlockSpec((1, tS, W), cs_index_map)

    out_flat = pl.pallas_call(
        _rope_kernel,
        out_shape=jax.ShapeDtypeStruct((B, S, W), orig_dtype),
        grid_spec=pltpu.PrefetchScalarGridSpec(
            num_scalar_prefetch=0,
            grid=(n_s, B),                         # batch innermost: table block reuse
            in_specs=[x_spec, cs_spec, cs_spec, cs_spec],
            out_specs=x_spec,
        ),
        compiler_params=pltpu.CompilerParams(
            dimension_semantics=("parallel", "parallel"),
            vmem_limit_bytes=32 * 1024 * 1024,     # safe on v5e/v6e (128 MiB) and v7x (64 MiB)
        ),
    )(x_flat, cos, sina, sinb)
    return out_flat.reshape(B, S, H, D)


def _rope_reference(x, *, dim, end, theta=10000.0, position_ids=None):
    """Pure-JAX reference mirroring the PyTorch forward."""
    B, S, H, D = x.shape
    Dh = D // 2
    cur_end = end
    while S >= cur_end:
        cur_end *= 2
    if position_ids is not None:
        max_pos = int(np.max(np.asarray(position_ids)))
        while max_pos >= cur_end:
            cur_end *= 2
    half = dim // 2
    inv_freq = 1.0 / (theta ** (jnp.arange(0, dim, 2, dtype=jnp.float32)[:half] / dim))
    t = jnp.arange(cur_end, dtype=jnp.float32)
    freqs = jnp.outer(t, inv_freq)
    cos_tab, sin_tab = jnp.cos(freqs), jnp.sin(freqs)
    if position_ids is None:
        cos = cos_tab[:S][None, :, None, :]
        sin = sin_tab[:S][None, :, None, :]
    else:
        cos = cos_tab[position_ids][:, :, None, :]
        sin = sin_tab[position_ids][:, :, None, :]
    xp = x.astype(jnp.float32).reshape(B, S, H, Dh, 2)
    xr, xi = xp[..., 0], xp[..., 1]
    yr = xr * cos - xi * sin
    yi = xr * sin + xi * cos
    return jnp.stack([yr, yi], axis=-1).reshape(B, S, H, D).astype(x.dtype)


if __name__ == "__main__":
    key = jax.random.PRNGKey(0)

    # Shapes consistent with the module: (batch, seq, heads, inner_dim).
    B, S, H, D = 2, 8, 4, 32
    dim, end = D, 16

    x = jax.random.normal(key, (B, S, H, D), dtype=jnp.float32)

    # position_ids = None path.
    out = jax.block_until_ready(
        rotary_embedding(x, dim=dim, end=end, theta=10000.0, position_ids=None)
    )
    ref = _rope_reference(x, dim=dim, end=end, theta=10000.0, position_ids=None)
    np.testing.assert_allclose(np.asarray(out), np.asarray(ref), rtol=1e-5, atol=1e-5)

    # Explicit position_ids path (per-(b,s) cos/sin gather).
    pos = jnp.broadcast_to(jnp.arange(S)[None, :], (B, S)).astype(jnp.int32)
    out_p = jax.block_until_ready(
        rotary_embedding(x, dim=dim, end=end, theta=10000.0, position_ids=pos)
    )
    ref_p = _rope_reference(x, dim=dim, end=end, theta=10000.0, position_ids=pos)
    np.testing.assert_allclose(np.asarray(out_p), np.asarray(ref_p), rtol=1e-5, atol=1e-5)

    # Flattened-lane correctness with H not a multiple of 8 and D = 64
    # (exercises the (H, D) -> H*D flatten + buffer regrowth S >= end).
    B2, S2, H2, D2 = 1, 16, 3, 64
    x2 = jax.random.normal(jax.random.PRNGKey(1), (B2, S2, H2, D2), dtype=jnp.float32)
    out2 = jax.block_until_ready(
        rotary_embedding(x2, dim=D2, end=16, theta=10000.0, position_ids=None)
    )
    ref2 = _rope_reference(x2, dim=D2, end=16, theta=10000.0, position_ids=None)
    np.testing.assert_allclose(np.asarray(out2), np.asarray(ref2), rtol=1e-5, atol=1e-5)

    print("KERNEL_OK")
</pallas_src>

<mosaic_0001>
module attributes {stable_mosaic.version = 11 : i64} {
  func.func @_rope_kernel(%arg0: i32, %arg1: i32, %arg2: memref<1x8x128xf32, #tpu.memory_space<vmem>>, %arg3: memref<1x8x128xf32, #tpu.memory_space<vmem>>, %arg4: memref<1x8x128xf32, #tpu.memory_space<vmem>>, %arg5: memref<1x8x128xf32, #tpu.memory_space<vmem>>, %arg6: memref<1x8x128xf32, #tpu.memory_space<vmem>>) attributes {dimension_semantics = [#tpu.dimension_semantics<parallel>, #tpu.dimension_semantics<parallel>], iteration_bounds = array<i64: 1, 2>, scalar_prefetch = 0 : i64, scratch_operands = 0 : i64, tpu.core_type = #tpu.core_type<tc>, window_params = [{transform_indices = @transform_0, window_bounds = array<i64: 1, 8, 128>}, {transform_indices = @transform_1, window_bounds = array<i64: 1, 8, 128>}, {transform_indices = @transform_2, window_bounds = array<i64: 1, 8, 128>}, {transform_indices = @transform_3, window_bounds = array<i64: 1, 8, 128>}, {transform_indices = @transform_4, window_bounds = array<i64: 1, 8, 128>}]} {
    %c0 = arith.constant 0 : index
    %c0_0 = arith.constant 0 : index
    %c0_1 = arith.constant 0 : index
    %0 = vector.load %arg2[%c0, %c0_0, %c0_1] : memref<1x8x128xf32, #tpu.memory_space<vmem>>, vector<1x8x128xf32>
    %c127_i32 = arith.constant 127 : i32
    %1 = tpu.dynamic_rotate %0 by %c127_i32 dim 2 : vector<1x8x128xf32>, i32 -> vector<1x8x128xf32>
    %c1_i32 = arith.constant 1 : i32
    %2 = tpu.dynamic_rotate %0 by %c1_i32 dim 2 : vector<1x8x128xf32>, i32 -> vector<1x8x128xf32>
    %c0_2 = arith.constant 0 : index
    %c0_3 = arith.constant 0 : index
    %c0_4 = arith.constant 0 : index
    %3 = vector.load %arg3[%c0_2, %c0_3, %c0_4] : memref<1x8x128xf32, #tpu.memory_space<vmem>>, vector<1x8x128xf32>
    %4 = arith.mulf %0, %3 : vector<1x8x128xf32>
    %c0_5 = arith.constant 0 : index
    %c0_6 = arith.constant 0 : index
    %c0_7 = arith.constant 0 : index
    %5 = vector.load %arg4[%c0_5, %c0_6, %c0_7] : memref<1x8x128xf32, #tpu.memory_space<vmem>>, vector<1x8x128xf32>
    %6 = arith.mulf %1, %5 : vector<1x8x128xf32>
    %7 = arith.addf %4, %6 : vector<1x8x128xf32>
    %c0_8 = arith.constant 0 : index
    %c0_9 = arith.constant 0 : index
    %c0_10 = arith.constant 0 : index
    %8 = vector.load %arg5[%c0_8, %c0_9, %c0_10] : memref<1x8x128xf32, #tpu.memory_space<vmem>>, vector<1x8x128xf32>
    %9 = arith.mulf %2, %8 : vector<1x8x128xf32>
    %10 = arith.addf %7, %9 : vector<1x8x128xf32>
    %c0_11 = arith.constant 0 : index
    %c0_12 = arith.constant 0 : index
    %c0_13 = arith.constant 0 : index
    %11 = vector.load %arg6[%c0_11, %c0_12, %c0_13] : memref<1x8x128xf32, #tpu.memory_space<vmem>>, vector<1x8x128xf32>
    tpu.vector_store %arg6[%c0_11, %c0_12, %c0_13], %10 {strides = array<i32>} : memref<1x8x128xf32, #tpu.memory_space<vmem>>, vector<1x8x128xf32>,
    return
  }
  func.func @transform_0(%arg0: i32, %arg1: i32) -> (i32, i32, i32) {
    %c0_i32 = arith.constant 0 : i32
    %c0_i32_0 = arith.constant 0 : i32
    return %arg1, %arg0, %c0_i32 : i32, i32, i32
  }
  func.func @transform_1(%arg0: i32, %arg1: i32) -> (i32, i32, i32) {
    %c0_i32 = arith.constant 0 : i32
    %c0_i32_0 = arith.constant 0 : i32
    %c0_i32_1 = arith.constant 0 : i32
    return %c0_i32, %arg0, %c0_i32_0 : i32, i32, i32
  }
  func.func @transform_2(%arg0: i32, %arg1: i32) -> (i32, i32, i32) {
    %c0_i32 = arith.constant 0 : i32
    %c0_i32_0 = arith.constant 0 : i32
    %c0_i32_1 = arith.constant 0 : i32
    return %c0_i32, %arg0, %c0_i32_0 : i32, i32, i32
  }
  func.func @transform_3(%arg0: i32, %arg1: i32) -> (i32, i32, i32) {
    %c0_i32 = arith.constant 0 : i32
    %c0_i32_0 = arith.constant 0 : i32
    %c0_i32_1 = arith.constant 0 : i32
    return %c0_i32, %arg0, %c0_i32_0 : i32, i32, i32
  }
  func.func @transform_4(%arg0: i32, %arg1: i32) -> (i32, i32, i32) {
    %c0_i32 = arith.constant 0 : i32
    %c0_i32_0 = arith.constant 0 : i32
    return %arg1, %arg0, %c0_i32 : i32, i32, i32
  }
}

</mosaic_0001>

<bundles_post_ra>
// kernel: tpu_custom_call.1
= control target key start
LH: loop header
LB: loop body
LE: loop exit
PB: predicated region body
PF: predicated region fallthrough
CT: control target
= control target key end

     0   :  { %9 = vsyncpa [#allocation3], 0  ;;  %s987_s0 = inlined_call_operand.hbm [shape: f32[2,8,128], index: 0, kind: input, shape index: {}]   ;;  %s988_s1 = inlined_call_operand.hbm [shape: f32[1,8,128], index: 1, kind: input, shape index: {}]   ;;  %s989_s2 = inlined_call_operand.hbm [shape: f32[1,8,128], index: 2, kind: input, shape index: {}]   ;;  %s990_s3 = inlined_call_operand.vmem [shape: f32[1,8,128], index: 3, kind: input, shape index: {}]   ;;  %s991_s4 = inlined_call_operand.hbm [shape: f32[2,8,128], index: 4, kind: output, shape index: {}]  }
   0x1   :  { %11 = vsyncpa [#allocation3 + $0x1], 0 }
   0x2   :  { %12 = vsyncpa [#allocation6], 0 }
   0x3   :  { %13 = vsyncpa [#allocation4], 0 }
   0x4   :  { %15 = vsyncpa [#allocation4 + $0x1], 0  ;;  %s741_s15 = smov 0   ;;  %s743_s16 = smov 0  }
   0x5   :  { %s745_s17 = smov 0   ;;  %s747_s18 = smov 0  }
   0x6   :  { %s749_s19 = smov 0   ;;  %s751_s20 = smov 0  }
   0x7 LB: > { %s433_s21 = sadd.s32 4294967295, %s708_s20   ;;  %s434_s22 = sadd.s32 4294967294, %s708_s20   ;;  %s708_s20 = sphi %s751_s20, %s21_s20   ;;  %s704_s19 = sphi %s749_s19, %s1014_s19   ;;  %s700_s18 = sphi %s747_s18, %s1013_s18   ;;  %s696_s17 = sphi %s745_s17, %s1012_s17   ;;  %s692_s16 = sphi %s743_s16, %s1011_s16   ;;  %s688_s15 = sphi %s741_s15, %s1010_s15  }
   0x8   : > { %p55_p0 = scmp.ne.s32.totalorder %s692_s16, %s688_s15  ;;  %p775_p1 = scmp.eq.s32.totalorder %s433_s21, 0 }
   0x9   : > { %p779_p2 = scmp.eq.s32.totalorder %s433_s21, 1  ;;  %p165_p3 = scmp.eq.s32.totalorder %s434_s22, 1 }
   0xa   : > { %s996_s23 = scalar_select %p775_p1, 1, 0 }
   0xb   : > { %s997_s24 = scalar_select %p779_p2, 1, 0 }
   0xc   : > { %p785_p4 = por %p775_p1, %p55_p0  ;;  %p435_p5 = scmp.ge.s32.totalorder %s708_s20, 1 }
   0xd   : > { %p790_p6 = por %p165_p3, %p55_p0  ;;  %p172_p7 = scmp.lt.s32.totalorder %s708_s20, 3 }
   0xe   : > { %s998_s25 = scalar_select %p785_p4, 1, 0 }
   0xf   : > { %s999_s26 = scalar_select %p790_p6, 1, 0 }
  0x10   : > { %p795_p8 = pnand %p435_p5, %p172_p7  ;;  %s710_s28 = smov [#allocation5]  }
  0x11   : > { %s187_s29 = sshll.u32 %s710_s28, 4  ;;  %s711_s30 = smov [#allocation7]   ;;  %s188_s29 = int_to_ptr.vmem [resolvable:$true] %s187_s29 }
  0x12   : > { %s1000_s27 = scalar_select %p795_p8, 1, 0 }
  0x13   : > { %p463_p10 = pneg %p795_p8  ;;  %s200_s5 = sshll.u32 %s711_s30, 4  ;;  %s808_s5 = int_to_ptr.vmem [resolvable:$true] %s200_s5 }
  0x14   : > { %s536_s9 = scalar_lea.hbm %s988_s1, 128 }
  0x15   : > { %p804_p11 = pnand %p463_p10, %p775_p1  ;;  %p537_p12 = scmp.ne.s32.totalorder %s988_s1, %s536_s9 }
  0x16   : > { %p543_p5 = scmp.lt.u32.totalorder %s536_s9, %s988_s1 }
  0x17   : > { %p538_p13 = pneg %p804_p11 }
  0x19   : > { %p539_p0 = pnand %p538_p13, %p537_p12 }
  0x1b   : > { %p540_p3 = pneg %p539_p0 }
  0x1d   : > { %p545_p7 = pnand %p543_p5, %p540_p3 }
  0x1f   : > { %548 = shalt.err (!%p545_p7)
}
  0x20   : > { %s549_s14 = scalar_lea.vmem %s188_s29, 128  ;;  %p557_p1 = scmp.lt.s32.totalorder %s188_s29, %s188_s29 }
  0x21   : > { %p550_p10 = scmp.ne.s32.totalorder %s188_s29, %s549_s14  ;;  %p558_p4 = scmp.lt.s32.totalorder %s549_s14, %s549_s14 }
  0x23   : > { %p552_p9 = pnand %p550_p10, %p538_p13  ;;  %p559_p8 = por %p558_p4, %p557_p1 }
  0x25   : > { %p553_p6 = pneg %p552_p9 }
  0x27   : > { %p560_p2 = pnand %p559_p8, %p553_p6 }
  0x29   : > { %563 = shalt.err (!%p560_p2)
}
  0x2a   : > { %466 = dma.hbm_to_vmem [thread:$0]  (!%p804_p11), %s988_s1, 128, %s188_s29, [#allocation6]  }
  0x2b   : > { %s564_s7 = scalar_lea.hbm %s989_s2, 128 }
  0x2c   : > { %p565_p9 = scmp.ne.s32.totalorder %s989_s2, %s564_s7  ;;  %p571_p2 = scmp.lt.u32.totalorder %s564_s7, %s989_s2 }
  0x2e   : > { %p567_p1 = pnand %p565_p9, %p538_p13 }
  0x30   : > { %p568_p4 = pneg %p567_p1 }
  0x32   : > { %p573_p6 = pnand %p571_p2, %p568_p4 }
  0x34   : > { %576 = shalt.err (!%p573_p6)
}
  0x35   : > { %s577_s29 = scalar_lea.vmem %s808_s5, 128  ;;  %p585_p3 = scmp.lt.s32.totalorder %s808_s5, %s808_s5 }
  0x36   : > { %p578_p8 = scmp.ne.s32.totalorder %s808_s5, %s577_s29  ;;  %p586_p5 = scmp.lt.s32.totalorder %s577_s29, %s577_s29 }
  0x38   : > { %p580_p12 = pnand %p578_p8, %p538_p13  ;;  %p587_p7 = por %p586_p5, %p585_p3 }
  0x3a   : > { %p581_p0 = pneg %p580_p12 }
  0x3c   : > { %p588_p10 = pnand %p587_p7, %p581_p0 }
  0x3e   : > { %591 = shalt.err (!%p588_p10)
}
  0x3f   : > { %469 = dma.hbm_to_vmem [thread:$0]  (!%p804_p11), %s989_s2, 128, %s808_s5, [#allocation6]  }
  0x40   : > { %s30_s14 = sadd.s32 1, %s704_s19  ;;  %s42_s21 = sadd.s32 1, %s696_s17 }
  0x41   : > { %p31_p13 = scmp.ge.s32.totalorder %s30_s14, 2  ;;  %p49_p9 = scmp.ne.s32.totalorder %s696_s17, %s692_s16 }
  0x42   : > { %p50_p1 = scmp.eq.s32.totalorder %s708_s20, 0  ;;  %p480_p4 = scmp.lt.s32.totalorder %s708_s20, 2 }
  0x43   : > { %s1016_s14 = smov (%p31_p13, %s30_s14), 0  ;;  %p1002_p6 = scmp.ne.s32.totalorder %s997_s24, 0 }
  0x44   : > { %p51_p2 = por %p50_p1, %p49_p9  ;;  %s37_s22 = ssub.s32 %s704_s19, %s1016_s14 }
  0x45   : > { %p867_p8 = por %p1002_p6, %p49_p9  ;;  %s218_s28 = sand.u32 1, %s696_s17  }
  0x46   : > { %p40_p12 = scmp.eq.s32.totalorder %s37_s22, 0  ;;  %s440_s5 = sshll.u32 %s218_s28, 3 }
  0x47   : > { %s441_s30 = sshll.u32 %s704_s19, 7  ;;  %s222_s24 = scalar_lea.vmem [#allocation2], %s440_s5 }
  0x48   : > { %s876_s7 = scalar_select %p40_p12, %s696_s17, %s42_s21  }
  0x49   : > { %s881_s10 = scalar_lea.hbm %s987_s0, %s441_s30  ;;  %s230_s11 = sshll.u32 %s222_s24, 4  ;;  %s889_s11 = int_to_ptr.vmem [resolvable:$true] %s230_s11 }
  0x4a   : > { %p885_p11 = pnand %p480_p4, %p51_p2  ;;  %s219_s12 = scalar_lea.sflag [#allocation3], %s218_s28 }
  0x4b   : > { %s592_s13 = scalar_lea.hbm %s881_s10, 128  ;;  %s597_s5 = scalar_lea.hbm %s987_s0, 256 }
  0x4c   : > { %p593_p0 = scmp.ne.s32.totalorder %s881_s10, %s592_s13  ;;  %p594_p3 = pneg %p885_p11 }
  0x4d   : > { %p598_p10 = scmp.lt.u32.totalorder %s881_s10, %s987_s0  ;;  %p599_p13 = scmp.lt.u32.totalorder %s597_s5, %s592_s13 }
  0x4e   : > { %p595_p5 = pnand %p594_p3, %p593_p0  ;;  %p601_p1 = scmp.lt.u32.totalorder %s592_s13, %s881_s10 }
  0x4f   : > { %p600_p9 = por %p599_p13, %p598_p10 }
  0x50   : > { %p596_p7 = pneg %p595_p5 }
  0x51   : > { %p602_p4 = por %p601_p1, %p600_p9 }
  0x53   : > { %p603_p2 = pnand %p602_p4, %p596_p7 }
  0x55   : > { %606 = shalt.err (!%p603_p2)
}
  0x56   : > { %s607_s28 = scalar_lea.vmem %s889_s11, 128  ;;  %s712_s9 = smov [#allocation2]  }
  0x57   : > { %p608_p6 = scmp.ne.s32.totalorder %s889_s11, %s607_s28  ;;  %s612_s24 = sshll.u32 %s712_s9, 4  ;;  %s613_s24 = int_to_ptr.vmem [resolvable:$false] %s612_s24 }
  0x58   : > { %s614_s21 = scalar_lea.vmem %s613_s24, 256  ;;  %p615_p5 = scmp.lt.s32.totalorder %s889_s11, %s613_s24 }
  0x59   : > { %p610_p12 = pnand %p608_p6, %p594_p3  ;;  %p616_p10 = scmp.lt.s32.totalorder %s614_s21, %s607_s28 }
  0x5b   : > { %p611_p0 = pneg %p610_p12  ;;  %p617_p13 = por %p616_p10, %p615_p5 }
  0x5d   : > { %p618_p9 = pnand %p617_p13, %p611_p0 }
  0x5f   : > { %621 = shalt.err (!%p618_p9)
}
  0x60   : > { %473 = dma.hbm_to_vmem [thread:$0]  (!%p885_p11), %s881_s10, 128, %s889_s11, %s219_s12  }
  0x61   : > { %p1005_p7 = scmp.ne.s32.totalorder %s1000_s27, 0 }
  0x62   : > { %s919_s13 = sand.u32 (!%p1005_p7), 1, %s692_s16   ;;  %p1006_p3 = scmp.ne.s32.totalorder (!%p1005_p7), %s998_s25, 0 }
  0x63   : > { %239 = sbr.rel (%p1005_p7) target bundleno = 248 (0xf8), region = 36  ;;  %s443_s22 = sshll.u32 (!%p1005_p7), %s919_s13, 3 }
  0x64   : > { %s242_s5 = scalar_lea.sflag (!%p1005_p7), [#allocation3], %s919_s13  ;;  %s245_s30 = scalar_lea.vmem (!%p1005_p7), [#allocation2], %s443_s22 }
  0x6a   : > { %675 = dma.done.wait (%p1006_p3), %s242_s5, 128  }
  0x6b   : > { %677 = vsyncadd (%p1006_p3), %s242_s5, 4294967168  ;;  %p1007_p1 = scmp.ne.s32.totalorder %s996_s23, 0 }
  0x6d   : > { %679 = dma.done.wait (%p1007_p1), [#allocation6], 256  }
  0x6e   : > { %681 = vsyncadd (%p1007_p1), [#allocation6], 4294967040  ;;  %v286_v0 = vld [vmem:[%s245_s30] sm:$0xff]  ;;  %s713_s27 = smov 127   ;;  %s714_s10 = smov 1   ;;  %v291_v1 = vld [vmem:[#allocation5] sm:$0xff] }
  0x6f   : > { %287 = vrot.lane.b32.xlu0 %v286_v0, %s713_s27  ;;  %v293_v2 = vld [vmem:[#allocation7] sm:$0xff]  ;;  %v292_v4 = vmul.f32 %v291_v1, %v286_v0  ;;  %v296_v6 = vld [vmem:[%s990_s3] sm:$0xff]  ;;  %s448_s23 = sshll.u32 %s700_s18, 7  ;;  %s281_s29 = scalar_lea.vmem [#allocation8], %s443_s22 }
  0x70   : > { %s315_s12 = sshll.u32 %s281_s29, 4  ;;  %s938_s9 = scalar_lea.hbm %s991_s4, %s448_s23  ;;  %s940_s12 = int_to_ptr.vmem [resolvable:$true] %s315_s12 }
  0x71   : > { %s301_s24 = scalar_lea.sflag [#allocation4], %s919_s13  ;;  %s622_s21 = scalar_lea.vmem %s940_s12, 128 }
  0x72   : > { %p623_p11 = scmp.ne.s32.totalorder %s940_s12, %s622_s21  ;;  %s715_s18 = smov [#allocation8]  }
  0x73   : > { %289 = vrot.lane.b32.xlu0 %v286_v0, %s714_s10  ;;  %s626_s22 = sshll.u32 %s715_s18, 4  ;;  %s627_s22 = int_to_ptr.vmem [resolvable:$false] %s626_s22 }
  0x74   : > { %p624_p4 = pnand %p623_p11, %p867_p8  ;;  %s628_s5 = scalar_lea.vmem %s627_s22, 256 }
  0x75   : > { %p629_p6 = scmp.lt.s32.totalorder %s940_s12, %s627_s22  ;;  %p630_p12 = scmp.lt.s32.totalorder %s628_s5, %s622_s21 }
  0x76   : > { %p625_p2 = pneg %p624_p4 }
  0x77   : > { %p631_p0 = por %p630_p12, %p629_p6 }
  0x79   : > { %p632_p5 = pnand %p631_p0, %p625_p2 }
  0xe1   : > { %v288_v3 = vpop.permute.xlu0 %287 }
  0xe2   : > { %v294_v5 = vmul.f32 %v293_v2, %v288_v3 }
  0xe4   : > { %v295_v8 = vadd.f32 %v294_v5, %v292_v4 }
  0xe5   : > { %v290_v7 = vpop.permute.xlu0 %289 }
  0xe6   : > { %v297_v9 = vmul.f32 %v296_v6, %v290_v7 }
  0xe8   : > { %v298_v10 = vadd.f32 %v297_v9, %v295_v8 }
  0xea   : > { %299 = vst [vmem:[%s281_s29] sm:$0xff] %v298_v10 }
  0xeb   : > { %635 = shalt.err (!%p632_p5)
}
  0xec   : > { %s636_s13 = scalar_lea.hbm %s938_s9, 128  ;;  %s640_s10 = scalar_lea.hbm %s991_s4, 256 }
  0xed   : > { %p637_p10 = scmp.ne.s32.totalorder %s938_s9, %s636_s13  ;;  %p641_p7 = scmp.lt.u32.totalorder %s938_s9, %s991_s4 }
  0xee   : > { %p642_p3 = scmp.lt.u32.totalorder %s640_s10, %s636_s13  ;;  %p644_p11 = scmp.lt.u32.totalorder %s636_s13, %s938_s9 }
  0xef   : > { %p638_p13 = pnand %p637_p10, %p867_p8 }
  0xf0   : > { %p643_p1 = por %p642_p3, %p641_p7 }
  0xf1   : > { %p639_p9 = pneg %p638_p13 }
  0xf2   : > { %p645_p4 = por %p644_p11, %p643_p1 }
  0xf4   : > { %p646_p2 = pnand %p645_p4, %p639_p9 }
  0xf6   : > { %649 = shalt.err (!%p646_p2)
}
  0xf7   : > { %461 = dma.vmem_to_hbm [thread:$0]  (%p867_p8), %s940_s12, 128, %s938_s9, %s301_s24  }
  0xf8 PF: > { %s327_s23 = sand.u32 1, %s688_s15   ;;  %p1008_p6 = scmp.ne.s32.totalorder %s999_s26, 0 }
  0xf9   : > { %p1009_p12 = scmp.ge.s32.totalorder %s708_s20, 2  ;;  %s328_s29 = scalar_lea.sflag [#allocation4], %s327_s23 }
  0xfb   : > { %p475_p0 = pnand %p1009_p12, %p1008_p6 }
  0xfd   : > { %683 = dma.done.wait (!%p475_p0), %s328_s29, 128  }
  0xfe   : > { %685 = vsyncadd (!%p475_p0), %s328_s29, 4294967168  ;;  %s21_s20 = sadd.s32 1, %s708_s20   ;;  %s1010_s15 = smov %s692_s16 }
  0xff   : > { %p18_p5 = scmp.ge.s32.totalorder %s21_s20, 4   ;;  %s1011_s16 = smov %s696_s17 }
 0x100   : > { %s1012_s17 = smov %s876_s7  ;;  %s1013_s18 = smov %s704_s19 }
 0x101   : > { %s1014_s19 = smov %s1016_s14  ;;  %20 = sbr.rel (!%p18_p5) target bundleno = 7 (0x7), region = 94 }
 0x108   :  { %333 = vsyncpa [#allocation3], 1 }
 0x109   :  { %335 = vsyncpa [#allocation3 + $0x1], 1 }
 0x10a   :  { %336 = vsyncpa [#allocation6], 1 }
 0x10b   :  { %337 = vsyncpa [#allocation4], 1 }
 0x10c   :  { %339 = vsyncpa [#allocation4 + $0x1], 1 }

</bundles_post_ra>
